<compile_context>
chip_gen: v6e
topology: v6e:2x2x1
jax: 0.10.0
libtpu: 0.0.40
codegen_flags: <defaults>
</compile_context>

<pallas_src>
import jax
import jax.numpy as jnp
import numpy as np
from jax import lax
from jax.experimental import pallas as pl
from jax.experimental.pallas import tpu as pltpu

C_IN, C_OUT = 3, 8
EPS = 1e-5
MIN_V, MAX_V = -0.9, 0.9
LANE_PAD = 128          # padded tail of the output slab; lanes [HW, HW+4) hold corners


def _make_kernel(H, W):
    HW = H * W
    Ho, Wo = 2 * H - 1, 2 * W - 1              # conv-transpose output spatial size
    inv_M = 1.0 / float(Ho * Wo)               # 1 / (#elements per channel seen by BN)
    # Lattice pixel feeding each of the 4 final-output corners (flat i*W + j index):
    #   out(0,0)<-lat(0,0)   out(0,2W-1)<-lat(0,W-1)
    #   out(2H-1,0)<-lat(H-1,0)   out(2H-1,2W-1)<-lat(H-1,W-1)
    corner_flat = (0, W - 1, (H - 1) * W, (H - 1) * W + (W - 1))

    def kernel(x_ref, p_ref, out_ref):
        p = p_ref[...]                                    # (C_OUT, 6) packed params
        bias, gamma, beta = p[:, 3:4], p[:, 4:5], p[:, 5:6]

        # --- 1x1 / stride-2 conv-transpose "lattice" values minus bias (VPU FMAs).
        # conv0 := conv - bias, so bias-only background pixels contribute exactly 0
        # to the BN moments.  (An MXU (HW,3)x(3,8) contraction would leave the MXU
        # >99% idle and cost bf16 rounding.)
        x = x_ref[...]                                    # (C_IN, HW) lane-dense
        conv0 = p[:, 0:1] * x[0:1, :]
        for c in range(1, C_IN):
            conv0 = conv0 + p[:, c:c + 1] * x[c:c + 1, :]

        # --- BatchNorm2d (training, biased var) over the implicit (Ho, Wo) map:
        # single pass, bias-shifted moments (cancellation-safe, no second slab pass).
        s1 = jnp.sum(conv0, axis=1, keepdims=True) * inv_M           # E[x - bias]
        s2 = jnp.sum(conv0 * conv0, axis=1, keepdims=True) * inv_M   # E[(x - bias)^2]
        var = s2 - s1 * s1
        inv = gamma * lax.rsqrt(var + EPS)
        bgp = beta - s1 * inv          # = bias*inv + shift  (BN of the background)

        # --- BN + ReLU6 ---
        conv_post = jnp.clip(conv0 * inv + bgp, 0.0, 6.0)   # lattice values
        bg = jnp.clip(bgp, 0.0, 6.0)                        # background (C_OUT, 1)

        # --- MaxPool2d(2, stride=1, pad=1) + clamp + tanh.  Every output pixel
        # except the 4 corners is max(lattice, background); one full-slab EUP pass,
        # stored ONCE (unmasked, lane-dense).
        out_ref[:, :HW] = jnp.tanh(jnp.clip(jnp.maximum(conv_post, bg), MIN_V, MAX_V))

        # --- The 4 output corners see only their lattice value: gather the 4
        # columns, one clip+tanh, one tiny store into the padded tail of the slab.
        cols = jnp.concatenate([conv_post[:, i:i + 1] for i in corner_flat], axis=1)
        out_ref[:, HW:HW + 4] = jnp.tanh(jnp.clip(cols, MIN_V, MAX_V))

    return kernel


@jax.jit
def model_forward(x, wt, bias, gamma, beta):
    """x: (1, C_IN, H, W) f32 NCHW; wt: (C_IN, C_OUT, 1, 1) (PyTorch ConvTranspose2d
    layout); bias/gamma/beta: (C_OUT,).  Returns (1, C_OUT, 2H, 2W) f32."""
    N, C, H, W = x.shape
    assert N == 1 and C == C_IN, "kernel is specialized to the module's N=1, C_in=3"
    assert H >= 2 and W >= 2, "parity-slab pooling assumes H, W >= 2"
    HW = H * W

    x_flat = x[0].reshape(C_IN, HW)                         # lane-dense spatial axis
    # Pack conv weight / bias / gamma / beta into ONE small VMEM input (one DMA
    # setup instead of four).  In a real model this packing is precomputed once.
    w2 = jnp.transpose(wt[:, :, 0, 0])                      # (C_OUT, C_IN)
    params = jnp.concatenate(
        [w2, bias[:, None], gamma[:, None], beta[:, None]], axis=1)   # (C_OUT, 6)

    packed = pl.pallas_call(
        _make_kernel(H, W),
        out_shape=jax.ShapeDtypeStruct((C_OUT, HW + LANE_PAD), jnp.float32),
        in_specs=[pl.BlockSpec(memory_space=pltpu.MemorySpace.VMEM)] * 2,
        out_specs=pl.BlockSpec(memory_space=pltpu.MemorySpace.VMEM),
    )(x_flat, params)

    t_base = packed[:, :HW].reshape(C_OUT, H, 1, W, 1)
    corners = packed[:, HW:HW + 4]                          # (C_OUT, 4)

    # Glue (single fused XLA pass): parity-interleave the unique slab into the final
    # (2H, 2W) grid and patch the 4 corner pixels.  Reads ~0.4 MB, writes the final
    # ~1.6 MB once (the previous version wrote 4x1.6 MB from the kernel AND ran a
    # separate full-array transpose pass).
    out = jnp.broadcast_to(t_base, (C_OUT, H, 2, W, 2)).reshape(C_OUT, 2 * H, 2 * W)
    row = jnp.arange(2 * H)[None, :, None]
    col = jnp.arange(2 * W)[None, None, :]
    out = jnp.where((row == 0) & (col == 0), corners[:, 0:1, None], out)
    out = jnp.where((row == 0) & (col == 2 * W - 1), corners[:, 1:2, None], out)
    out = jnp.where((row == 2 * H - 1) & (col == 0), corners[:, 2:3, None], out)
    out = jnp.where((row == 2 * H - 1) & (col == 2 * W - 1), corners[:, 3:4, None], out)
    return out[None]


def reference_forward(x, wt, bias, gamma, beta):
    """Plain-JAX reference mirroring the PyTorch forward exactly."""
    N, _, H, W = x.shape
    Ho, Wo = 2 * H - 1, 2 * W - 1
    conv = jnp.einsum('nchw,co->nohw', x, wt[:, :, 0, 0])
    up = jnp.zeros((N, C_OUT, Ho, Wo), x.dtype).at[:, :, ::2, ::2].set(conv)
    up = up + bias[None, :, None, None]
    mean = up.mean(axis=(0, 2, 3), keepdims=True)
    var = jnp.var(up, axis=(0, 2, 3), keepdims=True)          # biased (training BN)
    bn = (up - mean) / jnp.sqrt(var + EPS) * gamma[None, :, None, None] \
         + beta[None, :, None, None]
    r6 = jnp.clip(bn, 0.0, 6.0)
    pad = jnp.pad(r6, ((0, 0), (0, 0), (1, 1), (1, 1)), constant_values=-jnp.inf)
    pooled = jnp.maximum(
        jnp.maximum(pad[:, :, 0:Ho + 1, 0:Wo + 1], pad[:, :, 1:Ho + 2, 0:Wo + 1]),
        jnp.maximum(pad[:, :, 0:Ho + 1, 1:Wo + 2], pad[:, :, 1:Ho + 2, 1:Wo + 2]))
    return jnp.tanh(jnp.clip(pooled, MIN_V, MAX_V))


if __name__ == "__main__":
    key = jax.random.PRNGKey(0)
    k1, k2, k3, k4, k5 = jax.random.split(key, 5)
    H = W = 16                                           # small spatial size
    x = jax.random.normal(k1, (1, C_IN, H, W), jnp.float32)
    wt = 0.5 * jax.random.normal(k2, (C_IN, C_OUT, 1, 1), jnp.float32)
    bias = 0.1 * jax.random.normal(k3, (C_OUT,), jnp.float32)
    gamma = 1.0 + 0.1 * jax.random.normal(k4, (C_OUT,), jnp.float32)
    beta = 0.1 * jax.random.normal(k5, (C_OUT,), jnp.float32)

    out = model_forward(x, wt, bias, gamma, beta)
    jax.block_until_ready(out)
    assert out.shape == (1, C_OUT, 2 * H, 2 * W)

    ref = reference_forward(x, wt, bias, gamma, beta)
    np.testing.assert_allclose(np.asarray(out), np.asarray(ref), atol=1e-4, rtol=1e-4)
    print("KERNEL_OK")
</pallas_src>

<mosaic_0001>
module attributes {stable_mosaic.version = 11 : i64} {
  func.func @kernel(%arg0: memref<3x256xf32, #tpu.memory_space<vmem>>, %arg1: memref<8x6xf32, #tpu.memory_space<vmem>>, %arg2: memref<8x384xf32, #tpu.memory_space<vmem>>) attributes {dimension_semantics = [], scalar_prefetch = 0 : i64, scratch_operands = 0 : i64, tpu.core_type = #tpu.core_type<tc>} {
    %c0 = arith.constant 0 : index
    %c0_0 = arith.constant 0 : index
    %0 = vector.load %arg1[%c0, %c0_0] : memref<8x6xf32, #tpu.memory_space<vmem>>, vector<8x6xf32>
    %1 = vector.extract_strided_slice %0 {offsets = [0, 4], sizes = [8, 1], strides = [1, 1]} : vector<8x6xf32> to vector<8x1xf32>
    %2 = vector.extract_strided_slice %0 {offsets = [0, 5], sizes = [8, 1], strides = [1, 1]} : vector<8x6xf32> to vector<8x1xf32>
    %c0_1 = arith.constant 0 : index
    %c0_2 = arith.constant 0 : index
    %3 = vector.load %arg0[%c0_1, %c0_2] : memref<3x256xf32, #tpu.memory_space<vmem>>, vector<3x256xf32>
    %4 = vector.extract_strided_slice %0 {offsets = [0, 0], sizes = [8, 1], strides = [1, 1]} : vector<8x6xf32> to vector<8x1xf32>
    %5 = vector.extract_strided_slice %3 {offsets = [0, 0], sizes = [1, 256], strides = [1, 1]} : vector<3x256xf32> to vector<1x256xf32>
    %6 = vector.broadcast %4 : vector<8x1xf32> to vector<8x256xf32>
    %7 = vector.broadcast %5 : vector<1x256xf32> to vector<8x256xf32>
    %8 = arith.mulf %6, %7 : vector<8x256xf32>
    %9 = vector.extract_strided_slice %0 {offsets = [0, 1], sizes = [8, 1], strides = [1, 1]} : vector<8x6xf32> to vector<8x1xf32>
    %10 = vector.extract_strided_slice %3 {offsets = [1, 0], sizes = [1, 256], strides = [1, 1]} : vector<3x256xf32> to vector<1x256xf32>
    %11 = vector.broadcast %9 : vector<8x1xf32> to vector<8x256xf32>
    %12 = vector.broadcast %10 : vector<1x256xf32> to vector<8x256xf32>
    %13 = arith.mulf %11, %12 : vector<8x256xf32>
    %14 = arith.addf %8, %13 : vector<8x256xf32>
    %15 = vector.extract_strided_slice %0 {offsets = [0, 2], sizes = [8, 1], strides = [1, 1]} : vector<8x6xf32> to vector<8x1xf32>
    %16 = vector.extract_strided_slice %3 {offsets = [2, 0], sizes = [1, 256], strides = [1, 1]} : vector<3x256xf32> to vector<1x256xf32>
    %17 = vector.broadcast %15 : vector<8x1xf32> to vector<8x256xf32>
    %18 = vector.broadcast %16 : vector<1x256xf32> to vector<8x256xf32>
    %19 = arith.mulf %17, %18 : vector<8x256xf32>
    %20 = arith.addf %14, %19 : vector<8x256xf32>
    %cst = arith.constant dense<0.000000e+00> : vector<8xf32>
    %21 = vector.multi_reduction <add>, %20, %cst [1] : vector<8x256xf32> to vector<8xf32>
    %22 = vector.shape_cast %21 : vector<8xf32> to vector<8x1xf32>
    %cst_3 = arith.constant 0.00104058278 : f32
    %23 = vector.broadcast %cst_3 : f32 to vector<8x1xf32>
    %24 = arith.mulf %22, %23 : vector<8x1xf32>
    %25 = arith.mulf %20, %20 : vector<8x256xf32>
    %cst_4 = arith.constant dense<0.000000e+00> : vector<8xf32>
    %26 = vector.multi_reduction <add>, %25, %cst_4 [1] : vector<8x256xf32> to vector<8xf32>
    %27 = vector.shape_cast %26 : vector<8xf32> to vector<8x1xf32>
    %cst_5 = arith.constant 0.00104058278 : f32
    %28 = vector.broadcast %cst_5 : f32 to vector<8x1xf32>
    %29 = arith.mulf %27, %28 : vector<8x1xf32>
    %30 = arith.mulf %24, %24 : vector<8x1xf32>
    %31 = arith.subf %29, %30 : vector<8x1xf32>
    %cst_6 = arith.constant 9.99999974E-6 : f32
    %32 = vector.broadcast %cst_6 : f32 to vector<8x1xf32>
    %33 = arith.addf %31, %32 : vector<8x1xf32>
    %34 = math.rsqrt %33 : vector<8x1xf32>
    %35 = arith.mulf %1, %34 : vector<8x1xf32>
    %36 = arith.mulf %24, %35 : vector<8x1xf32>
    %37 = arith.subf %2, %36 : vector<8x1xf32>
    %38 = vector.broadcast %35 : vector<8x1xf32> to vector<8x256xf32>
    %39 = arith.mulf %20, %38 : vector<8x256xf32>
    %40 = vector.broadcast %37 : vector<8x1xf32> to vector<8x256xf32>
    %41 = arith.addf %39, %40 : vector<8x256xf32>
    %cst_7 = arith.constant 0.000000e+00 : f32
    %cst_8 = arith.constant 6.000000e+00 : f32
    %42 = vector.broadcast %cst_7 : f32 to vector<8x256xf32>
    %43 = arith.maximumf %42, %41 : vector<8x256xf32>
    %44 = vector.broadcast %cst_8 : f32 to vector<8x256xf32>
    %45 = arith.minimumf %44, %43 : vector<8x256xf32>
    %cst_9 = arith.constant 0.000000e+00 : f32
    %cst_10 = arith.constant 6.000000e+00 : f32
    %46 = vector.broadcast %cst_9 : f32 to vector<8x1xf32>
    %47 = arith.maximumf %46, %37 : vector<8x1xf32>
    %48 = vector.broadcast %cst_10 : f32 to vector<8x1xf32>
    %49 = arith.minimumf %48, %47 : vector<8x1xf32>
    %50 = vector.broadcast %49 : vector<8x1xf32> to vector<8x256xf32>
    %51 = arith.maximumf %45, %50 : vector<8x256xf32>
    %cst_11 = arith.constant -0.899999976 : f32
    %cst_12 = arith.constant 0.899999976 : f32
    %52 = vector.broadcast %cst_11 : f32 to vector<8x256xf32>
    %53 = arith.maximumf %52, %51 : vector<8x256xf32>
    %54 = vector.broadcast %cst_12 : f32 to vector<8x256xf32>
    %55 = arith.minimumf %54, %53 : vector<8x256xf32>
    %56 = math.tanh %55 : vector<8x256xf32>
    %c0_13 = arith.constant 0 : index
    %c0_14 = arith.constant 0 : index
    %57 = vector.load %arg2[%c0_13, %c0_14] : memref<8x384xf32, #tpu.memory_space<vmem>>, vector<8x256xf32>
    tpu.vector_store %arg2[%c0_13, %c0_14], %56 {strides = array<i32>} : memref<8x384xf32, #tpu.memory_space<vmem>>, vector<8x256xf32>,
    %58 = vector.extract_strided_slice %45 {offsets = [0, 0], sizes = [8, 1], strides = [1, 1]} : vector<8x256xf32> to vector<8x1xf32>
    %59 = vector.extract_strided_slice %45 {offsets = [0, 15], sizes = [8, 1], strides = [1, 1]} : vector<8x256xf32> to vector<8x1xf32>
    %60 = vector.extract_strided_slice %45 {offsets = [0, 240], sizes = [8, 1], strides = [1, 1]} : vector<8x256xf32> to vector<8x1xf32>
    %61 = vector.extract_strided_slice %45 {offsets = [0, 255], sizes = [8, 1], strides = [1, 1]} : vector<8x256xf32> to vector<8x1xf32>
    %62 = tpu.concatenate %58, %59, %60, %61 in 1 : vector<8x1xf32>, vector<8x1xf32>, vector<8x1xf32>, vector<8x1xf32> -> vector<8x4xf32>
    %cst_15 = arith.constant -0.899999976 : f32
    %cst_16 = arith.constant 0.899999976 : f32
    %63 = vector.broadcast %cst_15 : f32 to vector<8x4xf32>
    %64 = arith.maximumf %63, %62 : vector<8x4xf32>
    %65 = vector.broadcast %cst_16 : f32 to vector<8x4xf32>
    %66 = arith.minimumf %65, %64 : vector<8x4xf32>
    %67 = math.tanh %66 : vector<8x4xf32>
    %c0_17 = arith.constant 0 : index
    %c256 = arith.constant 256 : index
    %68 = vector.load %arg2[%c0_17, %c256] : memref<8x384xf32, #tpu.memory_space<vmem>>, vector<8x4xf32>
    tpu.vector_store %arg2[%c0_17, %c256], %67 {strides = array<i32>} : memref<8x384xf32, #tpu.memory_space<vmem>>, vector<8x4xf32>,
    return
  }
}

</mosaic_0001>

<bundles_post_ra>
// kernel: squeeze.2
= control target key start
LH: loop header
LB: loop body
LE: loop exit
PB: predicated region body
PF: predicated region fallthrough
CT: control target
= control target key end

     0   :  { %2 = vsyncpa [#allocation1], 0  ;;  %s202_s6 = smov [#allocation0]   ;;  %s247_s0 = inlined_call_operand.hbm [shape: f32[1,3,16,16], index: 0, kind: input, shape index: {}]   ;;  %s248_s1 = inlined_call_operand.vmem [shape: f32[3,256], index: 1, kind: output, shape index: {}]  }
   0x1   :  { %s7_s7 = sshll.u32 %s202_s6, 4  ;;  %s8_s7 = int_to_ptr.vmem [resolvable:$true] %s7_s7 }
   0x2   :  { %s188_s8 = scalar_lea.vmem %s8_s7, 768  ;;  %p193_p1 = scmp.lt.s32.totalorder %s8_s7, %s8_s7 }
   0x3   :  { %p189_p0 = scmp.ne.s32.totalorder %s8_s7, %s188_s8  ;;  %p194_p2 = scmp.lt.s32.totalorder %s188_s8, %s188_s8 }
   0x5   :  { %p195_p3 = por %p194_p2, %p193_p1 }
   0x7   :  { %p196_p4 = pnand %p195_p3, %p189_p0 }
   0x9   :  { %199 = shalt.err (!%p196_p4)
}
   0xa   :  { %10 = dma.hbm_to_vmem [thread:$0]  %s247_s0, 768, %s8_s7, [#allocation1]  }
   0xb   :  { %200 = dma.done.wait [#allocation1], 768  }
   0xc   :  { %201 = vsyncadd [#allocation1], 4294966528  ;;  %s24_s0 = smov 3  ;;  %s27_s11 = smov 12  ;;  %vm29_vm0 = vcmask 1043458   ;;  %vm15_vm1 = vcmask 1045508  }
   0xd   :  { %s32_s12 = smov 48  ;;  %s62_s13 = smov 3  ;;  %v25_v0 = vld [vmem:[#allocation0 + $0x7] ss:$16 sm:%s24_s0]   ;;  %vm17_vm2 = vcmask 130048   ;;  %vm38_vm3 = vcmask 1048448  }
   0xe   :  { %s65_s14 = smov 12  ;;  %s70_s15 = smov 48  ;;  %v28_v1 = vld [vmem:[#allocation0 + $0x57] ss:$-24 sm:%s27_s11]   ;;  %v63_v4 = vld [vmem:[#allocation0 + $0x5] ss:$16 sm:%s62_s13]  }
   0xf   :  { %s43_s16 = smov 3  ;;  %s46_s17 = smov 12  ;;  %v33_v2 = vld [vmem:[#allocation0 - $0x21] ss:$16 sm:%s32_s12]   ;;  %v30_v3 = vsel %vm29_vm0, %v28_v1, %v25_v0  ;;  %v66_v5 = vld [vmem:[#allocation0 + $0x55] ss:$-24 sm:%s65_s14]  }
  0x10   :  { %s51_s18 = smov 48  ;;  %s81_s19 = smov 3  ;;  %v71_v6 = vld [vmem:[#allocation0 - $0x23] ss:$16 sm:%s70_s15]   ;;  %v35_v7 = vsel %vm15_vm1, %v33_v2, %v30_v3  ;;  %v68_v8 = vsel %vm29_vm0, %v66_v5, %v63_v4  ;;  %v44_v9 = vld [vmem:[#allocation0 + $0x6] ss:$16 sm:%s43_s16]  }
  0x11   :  { %s84_s20 = smov 12  ;;  %v47_v10 = vld [vmem:[#allocation0 + $0x56] ss:$-24 sm:%s46_s17]   ;;  %s203_s21 = smov 112   ;;  %v73_v12 = vsel %vm15_vm1, %v71_v6, %v68_v8  ;;  %v82_v14 = vld [vmem:[#allocation0 + $0x4] ss:$16 sm:%s81_s19]  }
  0x12   :  { %v52_v11 = vld [vmem:[#allocation0 - $0x22] ss:$16 sm:%s51_s18]   ;;  %36 = vrot.lane.b32.xlu0 %v35_v7, %s203_s21  ;;  %v49_v13 = vsel %vm29_vm0, %v47_v10, %v44_v9  ;;  %v85_v15 = vld [vmem:[#allocation0 + $0x54] ss:$-24 sm:%s84_s20]   ;;  %s89_s22 = smov 48  ;;  %s204_s23 = smov 80  }
  0x13   :  { %74 = vrot.lane.b32.xlu1 %v73_v12, %s204_s23  ;;  %v54_v16 = vsel %vm15_vm1, %v52_v11, %v49_v13  ;;  %v87_v17 = vsel %vm29_vm0, %v85_v15, %v82_v14  ;;  %v90_v18 = vld [vmem:[#allocation0 - $0x24] ss:$16 sm:%s89_s22]   ;;  %s100_s24 = smov 3  ;;  %s103_s25 = smov 12  ;;  %vm57_vm4 = vcmask 917248   ;;  %vm76_vm5 = vcmask 786048  }
  0x14   :  { %v92_v19 = vsel %vm15_vm1, %v90_v18, %v87_v17  ;;  %v101_v20 = vld [vmem:[#allocation0 + $0x3] ss:$16 sm:%s100_s24]   ;;  %s108_s26 = smov 48  ;;  %s119_s27 = smov 3  ;;  %vm95_vm6 = vcmask 654848   ;;  %vm114_vm7 = vcmask 523648  }
  0x15   :  { %v104_v21 = vld [vmem:[#allocation0 + $0x53] ss:$-24 sm:%s103_s25]   ;;  %s122_s28 = smov 12  ;;  %s205_s29 = smov 96   ;;  %v120_v24 = vld [vmem:[#allocation0 + $0x2] ss:$16 sm:%s119_s27]  }
  0x16   :  { %v106_v22 = vsel %vm29_vm0, %v104_v21, %v101_v20  ;;  %v109_v23 = vld [vmem:[#allocation0 - $0x25] ss:$16 sm:%s108_s26]   ;;  %55 = vrot.lane.b32.xlu0 %v54_v16, %s205_s29  ;;  %v123_v25 = vld [vmem:[#allocation0 + $0x52] ss:$-24 sm:%s122_s28]   ;;  %s127_s30 = smov 48  ;;  %s206_s2 = smov 64  }
  0x17   :  { %93 = vrot.lane.b32.xlu1 %v92_v19, %s206_s2  ;;  %v111_v26 = vsel %vm15_vm1, %v109_v23, %v106_v22  ;;  %v125_v27 = vsel %vm29_vm0, %v123_v25, %v120_v24  ;;  %v128_v28 = vld [vmem:[#allocation0 - $0x26] ss:$16 sm:%s127_s30]   ;;  %s138_s3 = smov 3  ;;  %s141_s4 = smov 12  ;;  %vm133_vm8 = vcmask 392448   ;;  %vm152_vm9 = vcmask 261248  }
  0x18   :  { %v130_v29 = vsel %vm15_vm1, %v128_v28, %v125_v27  ;;  %v139_v30 = vld [vmem:[#allocation0 + $0x1] ss:$16 sm:%s138_s3]   ;;  %s146_s5 = smov 48  ;;  %s13_s6 = smov 48 }
  0x19   :  { %v142_v31 = vld [vmem:[#allocation0 + $0x51] ss:$-24 sm:%s141_s4]   ;;  %v12_v34 = vld [vmem:[#allocation0] ss:$8 sm:$0xf]   ;;  %s207_s7 = smov 48  }
  0x1a   :  { %v144_v32 = vsel %vm29_vm0, %v142_v31, %v139_v30  ;;  %v147_v33 = vld [vmem:[#allocation0 - $0x27] ss:$16 sm:%s146_s5]   ;;  %112 = vrot.lane.b32.xlu0 %v111_v26, %s207_s7  ;;  %v14_v35 = vld [vmem:[#allocation0] ss:$8 sm:%s13_s6]   ;;  %s208_s8 = smov 32   ;;  %s209_s9 = smov 16  }
  0x1b   :  { %131 = vrot.lane.b32.xlu1 %v130_v29, %s208_s8  ;;  %v149_v36 = vsel %vm15_vm1, %v147_v33, %v144_v32  ;;  %v16_v37 = vsel %vm15_vm1, %v14_v35, %v12_v34 }
  0x1c   :  { %18 = vst.msk [vmem:[#allocation2] ss:$8 sm:$0x3] %vm17_vm2, %v16_v37   ;;  %20 = vst.msk [vmem:[#allocation2 - $0xf] ss:$8 sm:$0xc] %vm17_vm2, %v16_v37  }
  0x1d   :  { %22 = vst.msk [vmem:[#allocation2 - $0x1e] ss:$8 sm:$0x30] %vm17_vm2, %v16_v37  }
  0x1e   :  { %150 = vrot.lane.b32.xlu0 %v149_v36, %s209_s9 }
  0x84   :  { %v37_v38 = vpop.permute.xlu0 %36  }
  0x85   :  { %v75_v39 = vpop.permute.xlu1 %74   ;;  %39 = vst.msk [vmem:[#allocation2] sm:$0x7] %vm38_vm3, %v37_v38   ;;  %41 = vst.msk [vmem:[#allocation2 + $0x5] sm:$0x38] %vm38_vm3, %v37_v38  }
  0x88   :  { %v56_v40 = vpop.permute.xlu0 %55  }
  0x89   :  { %58 = vst.msk [vmem:[#allocation2] sm:$0x7] %vm57_vm4, %v56_v40   ;;  %60 = vst.msk [vmem:[#allocation2 + $0x5] sm:$0x38] %vm57_vm4, %v56_v40   ;;  %v94_v41 = vpop.permute.xlu1 %93  }
  0x8a   :  { %77 = vst.msk [vmem:[#allocation2] sm:$0x7] %vm76_vm5, %v75_v39   ;;  %79 = vst.msk [vmem:[#allocation2 + $0x5] sm:$0x38] %vm76_vm5, %v75_v39  }
  0x8b   :  { %96 = vst.msk [vmem:[#allocation2] sm:$0x7] %vm95_vm6, %v94_v41   ;;  %98 = vst.msk [vmem:[#allocation2 + $0x5] sm:$0x38] %vm95_vm6, %v94_v41  }
  0x8c   :  { %v113_v42 = vpop.permute.xlu0 %112  }
  0x8d   :  { %115 = vst.msk [vmem:[#allocation2] sm:$0x7] %vm114_vm7, %v113_v42   ;;  %117 = vst.msk [vmem:[#allocation2 + $0x5] sm:$0x38] %vm114_vm7, %v113_v42   ;;  %v132_v43 = vpop.permute.xlu1 %131  }
  0x8e   :  { %134 = vst.msk [vmem:[#allocation2] sm:$0x7] %vm133_vm8, %v132_v43   ;;  %136 = vst.msk [vmem:[#allocation2 + $0x5] sm:$0x38] %vm133_vm8, %v132_v43  }
  0x90   :  { %v151_v44 = vpop.permute.xlu0 %150  }
  0x91   :  { %153 = vst.msk [vmem:[#allocation2] sm:$0x7] %vm152_vm9, %v151_v44   ;;  %155 = vst.msk [vmem:[#allocation2 + $0x5] sm:$0x38] %vm152_vm9, %v151_v44  }
  0x98   :  { %v160_v45 = vld [vmem:[#allocation2] sm:$0xf]  ;;  %v165_v46 = vld [vmem:[#allocation2 + $0x8] sm:$0xf] }
  0x99   :  { %163 = vst [vmem:[%s248_s1] sm:$0xf] %v160_v45  ;;  %171 = vst [vmem:[%s248_s1 + $0x4] sm:$0xf] %v165_v46 }
  0x9a   :  { %170 = vsyncpa [#allocation1], 1 }

// kernel: model_forward.1
= control target key start
LH: loop header
LB: loop body
LE: loop exit
PB: predicated region body
PF: predicated region fallthrough
CT: control target
= control target key end

     0   :  { %v199_v0 = vmov 0   ;;  %v200_v2 = vmov 2   ;;  %v201_v3 = vmov 1   ;;  %v19_v4 = vlaneseq  ;;  %s206_s13 = smov 18   ;;  %s207_s14 = smov 4   ;;  %s245_s1 = inlined_call_operand.vmem [shape: f32[8,6], index: 1, kind: input, shape index: {}]   ;;  %s246_s0 = inlined_call_operand.vmem [shape: f32[3,256], index: 0, kind: input, shape index: {}]   ;;  %s247_s2 = inlined_call_operand.vmem [shape: f32[8,384], index: 2, kind: output, shape index: {}]  }
   0x1   :  { %185 = vset.pattern.permute.xlu0 %v199_v0  ;;  %v226_v1 = vld [vmem:[%s245_s1] sm:$0xff]  ;;  %187 = vset.pattern.permute.xlu1 %v200_v2  ;;  %v202_v42 = vmov 4   ;;  %v203_v50 = vmov 5   ;;  %s205_s1 = smov 114   ;;  %vm158_vm0 = vcmask 7168   ;;  %vm160_vm1 = vcmask 15360  }
   0x2   :  { %15 = vperm.xlu0 %185, %v226_v1   ;;  %66 = vperm.xlu1 %187, %v226_v1   ;;  %v20_v5 = vshrl.u32 %v19_v4, 7  ;;  %v12_v8 = vld [vmem:[%s246_s0] sm:$0x77]  ;;  %s204_s0 = smov 1   ;;  %vm162_vm2 = vcmask 23552   ;;  %vm167_vm3 = vcmask 31744  }
   0x4   :  { %v21_v6 = vsub.s32 0, %v20_v5  ;;  %v25_v7 = vsub.s32 4, %v20_v5  ;;  %v45_v9 = vsub.s32 1, %v20_v5  ;;  %v49_v10 = vsub.s32 5, %v20_v5 }
   0x5   :  { %v71_v11 = vsub.s32 2, %v20_v5  ;;  %v75_v12 = vsub.s32 6, %v20_v5 }
   0x6   :  { %186 = vset.pattern.permute.xlu0 %v201_v3  ;;  %v22_v13 = vrot.slane %v12_v8, %v21_v6  ;;  %v26_v14 = vrot.slane %v12_v8, %v25_v7  ;;  %v46_v15 = vrot.slane %v12_v8, %v45_v9  ;;  %v50_v16 = vrot.slane %v12_v8, %v49_v10 }
   0x7   :  { %40 = vperm.xlu0 %186, %v226_v1   ;;  %v72_v17 = vrot.slane %v12_v8, %v71_v11  ;;  %v76_v18 = vrot.slane %v12_v8, %v75_v12  ;;  %189 = vset.pattern.permute.xlu1 %v203_v50 }
   0x8   :  { %v32_v20 = vrot.slane %v22_v13, %v21_v6  ;;  %v36_v21 = vrot.slane %v26_v14, %v21_v6  ;;  %v56_v22 = vrot.slane %v46_v15, %v45_v9  ;;  %v60_v23 = vrot.slane %v50_v16, %v45_v9 }
   0x9   :  { %v82_v24 = vrot.slane %v72_v17, %v71_v11  ;;  %v86_v25 = vrot.slane %v76_v18, %v71_v11 }
   0xb   :  { %188 = vset.pattern.permute.xlu0 %v202_v42 }
  0x7d   :  { %v16_v19 = vpop.permute.xlu0 %15  ;;  %v67_v26 = vpop.permute.xlu1 %66 }
  0x7e   :  { %v37_v27 = vmul.f32 %v32_v20, %v16_v19  ;;  %v38_v28 = vmul.f32 %v36_v21, %v16_v19  ;;  %v87_v32 = vmul.f32 %v82_v24, %v67_v26  ;;  %v88_v33 = vmul.f32 %v86_v25, %v67_v26 }
  0x82   :  { %v41_v29 = vpop.permute.xlu0 %40 }
  0x83   :  { %v61_v30 = vmul.f32 %v56_v22, %v41_v29  ;;  %v62_v31 = vmul.f32 %v60_v23, %v41_v29 }
  0x85   :  { %v63_v34 = vadd.f32 %v61_v30, %v37_v27  ;;  %v64_v35 = vadd.f32 %v62_v31, %v38_v28 }
  0x87   :  { %v89_v36 = vadd.f32 %v87_v32, %v63_v34  ;;  %v90_v37 = vadd.f32 %v88_v33, %v64_v35 }
  0x89   :  { %v91_v38 = vadd.f32 %v90_v37, %v89_v36  ;;  %v95_v39 = vmul.f32 %v89_v36, %v89_v36  ;;  %v96_v40 = vmul.f32 %v90_v37, %v90_v37 }
  0x8b   :  { %92 = vadd.xlane.f32.xlu1 %v91_v38  ;;  %v97_v41 = vadd.f32 %v96_v40, %v95_v39 }
  0x8d   :  { %98 = vadd.xlane.f32.xlu0 %v97_v41 }
 0x114   :  { %v93_v43 = vpop.xlane.xlu1 %92 }
 0x115   :  { %v94_v44 = vmul.f32 0.0010405828, %v93_v43 }
 0x116   :  { %v99_v45 = vpop.xlane.xlu0 %98 }
 0x117   :  { %v101_v46 = vmul.f32 %v94_v44, %v94_v44  ;;  %v100_v47 = vmul.f32 0.0010405828, %v99_v45 }
 0x119   :  { %v102_v48 = vsub.f32 %v100_v47, %v101_v46 }
 0x11b   :  { %v103_v49 = vadd.f32 1e-05, %v102_v48 }
 0x11d   :  { %191 = vrsqrt.f32 %v103_v49 }
 0x12a   :  { %v192_v51 = vpop.eup %191 }
 0x12b   :  { %v105_v52 = vmul.f32 %v192_v51, %v226_v1 }
 0x12d   :  { %114 = vperm.xlu0 %188, %v105_v52   ;;  %v106_v53 = vmul.f32 %v105_v52, %v94_v44 }
 0x12f   :  { %108 = vrot.lane.b32.xlu1 %v106_v53, %s204_s0 }
 0x131   :  { %190 = vset.pattern.permute.xlu0 %v203_v50 }
 0x1a1   :  { %v109_v54 = vpop.permute.xlu1 %108 }
 0x1a2   :  { %v111_v55 = vsub.f32 %v226_v1, %v109_v54 }
 0x1a4   :  { %v130_v56 = vmax.f32 %v111_v55, 0.0  ;;  %121 = vperm.xlu1 %189, %v111_v55  }
 0x1a6   :  { %v131_v57 = vmin.f32 %v130_v56, 6.0 }
 0x1a8   :  { %134 = vperm.xlu1 %189, %v131_v57   ;;  %v115_v58 = vpop.permute.xlu0 %114 }
 0x1a9   :  { %v117_v59 = vmul.f32 %v115_v58, %v89_v36  ;;  %v118_v60 = vmul.f32 %v115_v58, %v90_v37 }
 0x21f   :  { %v122_v61 = vpop.permute.xlu1 %121 }
 0x220   :  { %v124_v62 = vadd.f32 %v122_v61, %v117_v59  ;;  %v125_v63 = vadd.f32 %v122_v61, %v118_v60 }
 0x222   :  { %v126_v0 = vmax.f32 %v124_v62, 0.0  ;;  %v127_v2 = vmax.f32 %v125_v63, 0.0 }
 0x223   :  { %v135_v5 = vpop.permute.xlu1 %134 }
 0x224   :  { %v128_v3 = vmin.f32 %v126_v0, 6.0  ;;  %v129_v4 = vmin.f32 %v127_v2, 6.0 }
 0x226   :  { %v137_v6 = vmax.f32 %v128_v3, %v135_v5  ;;  %v138_v7 = vmax.f32 %v129_v4, %v135_v5  ;;  %148 = vrot.lane.b32.xlu1 %v128_v3, %s205_s1 }
 0x228   :  { %v173_v1 = vclamps-f32 %v137_v6, 0.9  ;;  %v174_v8 = vclamps-f32 %v138_v7, 0.9 }
 0x22a   :  { %193 = vtanh.f32 %v173_v1  ;;  %152 = vrot.lane.b32.xlu1 %v129_v4, %s206_s13 }
 0x22b   :  { %195 = vtanh.f32 %v174_v8 }
 0x22e   :  { %155 = vrot.lane.b32.xlu1 %v129_v4, %s207_s14 }
 0x237   :  { %v194_v9 = vpop.eup %193 }
 0x238   :  { %v196_v10 = vpop.eup %195  ;;  %145 = vst [vmem:[%s247_s2] sm:$0xff] %v194_v9 }
 0x239   :  { %146 = vst [vmem:[%s247_s2 + $0x8] sm:$0xff] %v196_v10 }
 0x298   :  { %v149_v11 = vpop.permute.xlu1 %148 }
 0x299   :  { %v159_v13 = vsel %vm158_vm0, %v128_v3, %v149_v11 }
 0x29c   :  { %v153_v12 = vpop.permute.xlu1 %152 }
 0x29d   :  { %v161_v14 = vsel %vm160_vm1, %v159_v13, %v153_v12 }
 0x2a0   :  { %v156_v15 = vpop.permute.xlu1 %155 }
 0x2a1   :  { %v163_v16 = vsel %vm162_vm2, %v161_v14, %v156_v15 }
 0x2a2   :  { %v175_v17 = vclamps-f32 %v163_v16, 0.9 }
 0x2a4   :  { %197 = vtanh.f32 %v175_v17 }
 0x2b1   :  { %v198_v18 = vpop.eup %197 }
 0x2b2   :  { %168 = vst.msk [vmem:[%s247_s2 + $0x10] sm:$0xff] %vm167_vm3, %v198_v18 }

</bundles_post_ra>
